<compile_context>
chip_gen: v7x
topology: tpu7x:2x2x1
jax: 0.10.0
libtpu: 0.0.40
codegen_flags: <defaults>
</compile_context>

<pallas_src>
import jax
import jax.numpy as jnp
from jax import lax
from jax.experimental import pallas as pl
from jax.experimental.pallas import tpu as pltpu

_BN_EPS = 1e-5


# ---------------------------------------------------------------------------
# Kernel
# ---------------------------------------------------------------------------
def _double_conv_kernel(x_ref, a1_ref, s1_ref, b1_ref, a2_ref, s2_ref, b2_ref, o_ref):
    # x_ref : (1, H, W*Cin)       bf16  one batch element, (w, ci) on the lane dim
    # a1_ref: (3, W*Cin, W*Cmid)  bf16  per-vertical-tap Toeplitz conv matrices, layer 1
    # s1/b1 : (1, W*Cmid)         f32   folded BN scale / (conv bias + BN) bias, tiled over w
    # a2_ref: (3, W*Cmid, W*Cout) bf16  layer 2
    # s2/b2 : (1, W*Cout)         f32
    # o_ref : (1, H, W*Cout)      f32   lane-dense output block
    H = x_ref.shape[1]

    # Row-shift matrices for the vertical halo (zero padding along H):
    #   (shift_dn @ p)[h] = p[h-1] (0 at h=0),  (shift_up @ p)[h] = p[h+1] (0 at h=H-1)
    row = lax.broadcasted_iota(jnp.int32, (H, H), 0)
    col = lax.broadcasted_iota(jnp.int32, (H, H), 1)
    shift_dn = (row == col + 1).astype(jnp.float32)
    shift_up = (row + 1 == col).astype(jnp.float32)

    def mm(a, b):
        return lax.dot_general(a, b, dimension_numbers=(((1,), (0,)), ((), ())),
                               preferred_element_type=jnp.float32)

    def conv3x3(t, a_ref):
        # 3x3 'same' conv in the (H, W*C) layout: one big Toeplitz matmul per vertical
        # tap (horizontal taps + W-padding folded into a_ref), then combine the three
        # taps with shift-matrix matmuls (H-padding).  Pure MXU work, no relayouts.
        p0 = mm(t, a_ref[0])          # uses input row h-1
        p1 = mm(t, a_ref[1])          # row h
        p2 = mm(t, a_ref[2])          # row h+1
        return mm(shift_dn, p0) + p1 + mm(shift_up, p2)

    # Layer 1: conv + folded-BN affine + ReLU; mid activation never leaves the chip.
    h1 = conv3x3(x_ref[0], a1_ref)                                    # (H, W*Cmid) f32
    h1 = jnp.maximum(h1 * s1_ref[...] + b1_ref[...], 0.0).astype(jnp.bfloat16)

    # Layer 2.
    h2 = conv3x3(h1, a2_ref)                                          # (H, W*Cout) f32
    o_ref[0] = jnp.maximum(h2 * s2_ref[...] + b2_ref[...], 0.0).astype(o_ref.dtype)


# ---------------------------------------------------------------------------
# Wrapper helpers
# ---------------------------------------------------------------------------
def _toeplitz_weights(w_hwio, width):
    """(3, 3, Cin, Co) HWIO conv weights -> (3, W*Cin, W*Co) Toeplitz matrices.

    A[dy, w_in*Cin + ci, w_out*Co + co] = w_hwio[dy, w_in - w_out + 1, ci, co]
    (zero where the horizontal tap index falls outside [0, 3)), so that a 3x3
    'same' conv becomes   out_row(h) = sum_dy  in_row(h + dy - 1) @ A[dy]
    in the row-major (W*C)-on-lanes layout, with the W zero-padding folded in.
    """
    _, _, cin, cout = w_hwio.shape
    win = jnp.arange(width)                      # input columns w'
    wout = jnp.arange(width)                     # output columns w
    dx = win[:, None] - wout[None, :] + 1        # (W, W) horizontal tap index
    valid = (dx >= 0) & (dx < 3)
    a = w_hwio[:, jnp.clip(dx, 0, 2), :, :]      # (3, W, W, Cin, Co) = (dy, w', w, ci, co)
    a = jnp.where(valid[None, :, :, None, None], a, 0.0)
    a = jnp.transpose(a, (0, 1, 3, 2, 4))        # (dy, w', ci, w, co)
    return a.reshape(3, width * cin, width * cout)


def _fold_bn(conv_b, gamma, beta, mean, var):
    scale = gamma / jnp.sqrt(var + _BN_EPS)
    bias = (conv_b - mean) * scale + beta
    return scale, bias


def double_conv_forward(x_nchw, params):
    """Matches DoubleConv.forward (NCHW in, NCHW out), eval-mode BatchNorm."""
    N, Cin, H, W = x_nchw.shape
    Cmid = params["w1"].shape[-1]
    Cout = params["w2"].shape[-1]

    # NCHW -> NHWC -> row-major 2D (N, H, W*Cin) layout (free reshape of NHWC), bf16.
    x2 = jnp.transpose(x_nchw, (0, 2, 3, 1)).reshape(N, H, W * Cin).astype(jnp.bfloat16)

    a1 = _toeplitz_weights(params["w1"], W).astype(jnp.bfloat16)   # (3, W*Cin,  W*Cmid)
    a2 = _toeplitz_weights(params["w2"], W).astype(jnp.bfloat16)   # (3, W*Cmid, W*Cout)
    s1 = jnp.tile(params["s1"].astype(jnp.float32), W).reshape(1, W * Cmid)
    b1 = jnp.tile(params["b1"].astype(jnp.float32), W).reshape(1, W * Cmid)
    s2 = jnp.tile(params["s2"].astype(jnp.float32), W).reshape(1, W * Cout)
    b2 = jnp.tile(params["b2"].astype(jnp.float32), W).reshape(1, W * Cout)

    out2d = pl.pallas_call(
        _double_conv_kernel,
        out_shape=jax.ShapeDtypeStruct((N, H, W * Cout), jnp.float32),
        grid_spec=pltpu.PrefetchScalarGridSpec(
            num_scalar_prefetch=0,
            grid=(N,),
            in_specs=[
                pl.BlockSpec((1, H, W * Cin), lambda n: (n, 0, 0)),
                pl.BlockSpec((3, W * Cin, W * Cmid), lambda n: (0, 0, 0)),
                pl.BlockSpec((1, W * Cmid), lambda n: (0, 0)),
                pl.BlockSpec((1, W * Cmid), lambda n: (0, 0)),
                pl.BlockSpec((3, W * Cmid, W * Cout), lambda n: (0, 0, 0)),
                pl.BlockSpec((1, W * Cout), lambda n: (0, 0)),
                pl.BlockSpec((1, W * Cout), lambda n: (0, 0)),
            ],
            out_specs=pl.BlockSpec((1, H, W * Cout), lambda n: (n, 0, 0)),
        ),
        compiler_params=pltpu.CompilerParams(
            dimension_semantics=("parallel",),        # batch axis -> both TCs on v7x
            vmem_limit_bytes=32 * 1024 * 1024,
        ),
    )(x2, a1, s1, b1, a2, s2, b2)

    out = out2d.reshape(N, H, W, Cout)
    return jnp.transpose(out, (0, 3, 1, 2))           # NHWC -> NCHW


# ---------------------------------------------------------------------------
# Params + reference
# ---------------------------------------------------------------------------
def make_double_conv_params(key, in_channels, out_channels, mid_channels=None):
    if mid_channels is None:
        mid_channels = out_channels
    ks = jax.random.split(key, 12)

    def conv_init(kw, kb, cin, cout):
        w = 0.1 * jax.random.normal(kw, (3, 3, cin, cout), jnp.float32)
        b = 0.1 * jax.random.normal(kb, (cout,), jnp.float32)
        return w, b

    def bn_init(kg, kb2, km, kv, c):
        gamma = 1.0 + 0.1 * jax.random.normal(kg, (c,), jnp.float32)
        beta = 0.1 * jax.random.normal(kb2, (c,), jnp.float32)
        mean = 0.1 * jax.random.normal(km, (c,), jnp.float32)
        var = jnp.abs(jax.random.normal(kv, (c,), jnp.float32)) + 0.5
        return gamma, beta, mean, var

    w1, cb1 = conv_init(ks[0], ks[1], in_channels, mid_channels)
    g1, be1, m1, v1 = bn_init(ks[2], ks[3], ks[4], ks[5], mid_channels)
    w2, cb2 = conv_init(ks[6], ks[7], mid_channels, out_channels)
    g2, be2, m2, v2 = bn_init(ks[8], ks[9], ks[10], ks[11], out_channels)

    s1, b1 = _fold_bn(cb1, g1, be1, m1, v1)
    s2, b2 = _fold_bn(cb2, g2, be2, m2, v2)
    return dict(w1=w1, s1=s1, b1=b1, w2=w2, s2=s2, b2=b2)


def _reference_forward(x_nchw, params):
    """Plain-JAX reference with matching numerics (bf16 inputs, f32 accumulation)."""
    x = jnp.transpose(x_nchw, (0, 2, 3, 1)).astype(jnp.bfloat16)

    def step(x, w, s, b):
        y = lax.conv_general_dilated(
            x, w.astype(jnp.bfloat16), window_strides=(1, 1), padding="SAME",
            dimension_numbers=("NHWC", "HWIO", "NHWC"),
            preferred_element_type=jnp.float32)
        return jnp.maximum(y * s + b, 0.0)

    y1 = step(x, params["w1"], params["s1"], params["b1"]).astype(jnp.bfloat16)
    y2 = step(y1, params["w2"], params["s2"], params["b2"])
    return jnp.transpose(y2, (0, 3, 1, 2))


if __name__ == "__main__":
    key = jax.random.PRNGKey(0)
    kx, kp = jax.random.split(key)

    N, Cin, H, W = 2, 4, 16, 16
    Cout = 8
    x = jax.random.normal(kx, (N, Cin, H, W), jnp.float32)
    params = make_double_conv_params(kp, Cin, Cout)

    out = double_conv_forward(x, params)
    out = jax.block_until_ready(out)
    assert out.shape == (N, Cout, H, W)

    ref = _reference_forward(x, params)
    assert jnp.allclose(out, ref, rtol=2e-2, atol=2e-2), "mismatch vs reference"

    print("KERNEL_OK")
</pallas_src>

<mosaic_0001>
module attributes {stable_mosaic.version = 11 : i64} {
  func.func @_double_conv_kernel(%arg0: i32, %arg1: memref<1x16x64xbf16, #tpu.memory_space<vmem>>, %arg2: memref<3x64x128xbf16, #tpu.memory_space<vmem>>, %arg3: memref<1x128xf32, #tpu.memory_space<vmem>>, %arg4: memref<1x128xf32, #tpu.memory_space<vmem>>, %arg5: memref<3x128x128xbf16, #tpu.memory_space<vmem>>, %arg6: memref<1x128xf32, #tpu.memory_space<vmem>>, %arg7: memref<1x128xf32, #tpu.memory_space<vmem>>, %arg8: memref<1x16x128xf32, #tpu.memory_space<vmem>>) attributes {dimension_semantics = [#tpu.dimension_semantics<parallel>], iteration_bounds = array<i64: 2>, scalar_prefetch = 0 : i64, scratch_operands = 0 : i64, tpu.core_type = #tpu.core_type<tc>, window_params = [{transform_indices = @transform_0, window_bounds = array<i64: 1, 16, 64>}, {pipeline_mode = #tpu.pipeline_mode<synchronous>, transform_indices = @transform_1, window_bounds = array<i64: 3, 64, 128>}, {pipeline_mode = #tpu.pipeline_mode<synchronous>, transform_indices = @transform_2, window_bounds = array<i64: 1, 128>}, {pipeline_mode = #tpu.pipeline_mode<synchronous>, transform_indices = @transform_3, window_bounds = array<i64: 1, 128>}, {pipeline_mode = #tpu.pipeline_mode<synchronous>, transform_indices = @transform_4, window_bounds = array<i64: 3, 128, 128>}, {pipeline_mode = #tpu.pipeline_mode<synchronous>, transform_indices = @transform_5, window_bounds = array<i64: 1, 128>}, {pipeline_mode = #tpu.pipeline_mode<synchronous>, transform_indices = @transform_6, window_bounds = array<i64: 1, 128>}, {transform_indices = @transform_7, window_bounds = array<i64: 1, 16, 128>}]} {
    %0 = tpu.iota {dimensions = array<i32: 0>} : vector<16x16xi32>
    %1 = tpu.iota {dimensions = array<i32: 1>} : vector<16x16xi32>
    %c1_i32 = arith.constant 1 : i32
    %2 = vector.broadcast %c1_i32 : i32 to vector<16x16xi32>
    %3 = arith.addi %1, %2 : vector<16x16xi32>
    %4 = arith.cmpi eq, %0, %3 : vector<16x16xi32>
    %5 = arith.extui %4 : vector<16x16xi1> to vector<16x16xi32>
    %6 = arith.sitofp %5 : vector<16x16xi32> to vector<16x16xf32>
    %c1_i32_0 = arith.constant 1 : i32
    %7 = vector.broadcast %c1_i32_0 : i32 to vector<16x16xi32>
    %8 = arith.addi %0, %7 : vector<16x16xi32>
    %9 = arith.cmpi eq, %8, %1 : vector<16x16xi32>
    %10 = arith.extui %9 : vector<16x16xi1> to vector<16x16xi32>
    %11 = arith.sitofp %10 : vector<16x16xi32> to vector<16x16xf32>
    %c0 = arith.constant 0 : index
    %c0_1 = arith.constant 0 : index
    %c0_2 = arith.constant 0 : index
    %12 = vector.load %arg1[%c0, %c0_1, %c0_2] : memref<1x16x64xbf16, #tpu.memory_space<vmem>>, vector<1x16x64xbf16>
    %13 = vector.shape_cast %12 : vector<1x16x64xbf16> to vector<16x64xbf16>
    %c0_3 = arith.constant 0 : index
    %c0_4 = arith.constant 0 : index
    %c0_5 = arith.constant 0 : index
    %14 = vector.load %arg2[%c0_3, %c0_4, %c0_5] : memref<3x64x128xbf16, #tpu.memory_space<vmem>>, vector<1x64x128xbf16>
    %15 = vector.shape_cast %14 : vector<1x64x128xbf16> to vector<64x128xbf16>
    %cst = arith.constant dense<0.000000e+00> : vector<16x128xf32>
    %16 = tpu.matmul %13, %15, %cst {dimension_numbers = #tpu.dot_dimension_numbers<[1], [0], [0], [1], [0, 0, 1, 1], [], []>} : vector<16x64xbf16>, vector<64x128xbf16>, vector<16x128xf32> -> vector<16x128xf32>
    %c1 = arith.constant 1 : index
    %c0_6 = arith.constant 0 : index
    %c0_7 = arith.constant 0 : index
    %17 = vector.load %arg2[%c1, %c0_6, %c0_7] : memref<3x64x128xbf16, #tpu.memory_space<vmem>>, vector<1x64x128xbf16>
    %18 = vector.shape_cast %17 : vector<1x64x128xbf16> to vector<64x128xbf16>
    %cst_8 = arith.constant dense<0.000000e+00> : vector<16x128xf32>
    %19 = tpu.matmul %13, %18, %cst_8 {dimension_numbers = #tpu.dot_dimension_numbers<[1], [0], [0], [1], [0, 0, 1, 1], [], []>} : vector<16x64xbf16>, vector<64x128xbf16>, vector<16x128xf32> -> vector<16x128xf32>
    %c2 = arith.constant 2 : index
    %c0_9 = arith.constant 0 : index
    %c0_10 = arith.constant 0 : index
    %20 = vector.load %arg2[%c2, %c0_9, %c0_10] : memref<3x64x128xbf16, #tpu.memory_space<vmem>>, vector<1x64x128xbf16>
    %21 = vector.shape_cast %20 : vector<1x64x128xbf16> to vector<64x128xbf16>
    %cst_11 = arith.constant dense<0.000000e+00> : vector<16x128xf32>
    %22 = tpu.matmul %13, %21, %cst_11 {dimension_numbers = #tpu.dot_dimension_numbers<[1], [0], [0], [1], [0, 0, 1, 1], [], []>} : vector<16x64xbf16>, vector<64x128xbf16>, vector<16x128xf32> -> vector<16x128xf32>
    %cst_12 = arith.constant dense<0.000000e+00> : vector<16x128xf32>
    %23 = tpu.matmul %6, %16, %cst_12 {dimension_numbers = #tpu.dot_dimension_numbers<[1], [0], [0], [1], [0, 0, 1, 1], [], []>} : vector<16x16xf32>, vector<16x128xf32>, vector<16x128xf32> -> vector<16x128xf32>
    %24 = arith.addf %23, %19 : vector<16x128xf32>
    %cst_13 = arith.constant dense<0.000000e+00> : vector<16x128xf32>
    %25 = tpu.matmul %11, %22, %cst_13 {dimension_numbers = #tpu.dot_dimension_numbers<[1], [0], [0], [1], [0, 0, 1, 1], [], []>} : vector<16x16xf32>, vector<16x128xf32>, vector<16x128xf32> -> vector<16x128xf32>
    %26 = arith.addf %24, %25 : vector<16x128xf32>
    %c0_14 = arith.constant 0 : index
    %c0_15 = arith.constant 0 : index
    %27 = vector.load %arg3[%c0_14, %c0_15] : memref<1x128xf32, #tpu.memory_space<vmem>>, vector<1x128xf32>
    %28 = vector.broadcast %27 : vector<1x128xf32> to vector<16x128xf32>
    %29 = arith.mulf %26, %28 : vector<16x128xf32>
    %c0_16 = arith.constant 0 : index
    %c0_17 = arith.constant 0 : index
    %30 = vector.load %arg4[%c0_16, %c0_17] : memref<1x128xf32, #tpu.memory_space<vmem>>, vector<1x128xf32>
    %31 = vector.broadcast %30 : vector<1x128xf32> to vector<16x128xf32>
    %32 = arith.addf %29, %31 : vector<16x128xf32>
    %cst_18 = arith.constant 0.000000e+00 : f32
    %33 = vector.broadcast %cst_18 : f32 to vector<16x128xf32>
    %34 = arith.maximumf %32, %33 : vector<16x128xf32>
    %35 = arith.truncf %34 : vector<16x128xf32> to vector<16x128xbf16>
    %c0_19 = arith.constant 0 : index
    %c0_20 = arith.constant 0 : index
    %c0_21 = arith.constant 0 : index
    %36 = vector.load %arg5[%c0_19, %c0_20, %c0_21] : memref<3x128x128xbf16, #tpu.memory_space<vmem>>, vector<1x128x128xbf16>
    %37 = vector.shape_cast %36 : vector<1x128x128xbf16> to vector<128x128xbf16>
    %cst_22 = arith.constant dense<0.000000e+00> : vector<16x128xf32>
    %38 = tpu.matmul %35, %37, %cst_22 {dimension_numbers = #tpu.dot_dimension_numbers<[1], [0], [0], [1], [0, 0, 1, 1], [], []>} : vector<16x128xbf16>, vector<128x128xbf16>, vector<16x128xf32> -> vector<16x128xf32>
    %c1_23 = arith.constant 1 : index
    %c0_24 = arith.constant 0 : index
    %c0_25 = arith.constant 0 : index
    %39 = vector.load %arg5[%c1_23, %c0_24, %c0_25] : memref<3x128x128xbf16, #tpu.memory_space<vmem>>, vector<1x128x128xbf16>
    %40 = vector.shape_cast %39 : vector<1x128x128xbf16> to vector<128x128xbf16>
    %cst_26 = arith.constant dense<0.000000e+00> : vector<16x128xf32>
    %41 = tpu.matmul %35, %40, %cst_26 {dimension_numbers = #tpu.dot_dimension_numbers<[1], [0], [0], [1], [0, 0, 1, 1], [], []>} : vector<16x128xbf16>, vector<128x128xbf16>, vector<16x128xf32> -> vector<16x128xf32>
    %c2_27 = arith.constant 2 : index
    %c0_28 = arith.constant 0 : index
    %c0_29 = arith.constant 0 : index
    %42 = vector.load %arg5[%c2_27, %c0_28, %c0_29] : memref<3x128x128xbf16, #tpu.memory_space<vmem>>, vector<1x128x128xbf16>
    %43 = vector.shape_cast %42 : vector<1x128x128xbf16> to vector<128x128xbf16>
    %cst_30 = arith.constant dense<0.000000e+00> : vector<16x128xf32>
    %44 = tpu.matmul %35, %43, %cst_30 {dimension_numbers = #tpu.dot_dimension_numbers<[1], [0], [0], [1], [0, 0, 1, 1], [], []>} : vector<16x128xbf16>, vector<128x128xbf16>, vector<16x128xf32> -> vector<16x128xf32>
    %cst_31 = arith.constant dense<0.000000e+00> : vector<16x128xf32>
    %45 = tpu.matmul %6, %38, %cst_31 {dimension_numbers = #tpu.dot_dimension_numbers<[1], [0], [0], [1], [0, 0, 1, 1], [], []>} : vector<16x16xf32>, vector<16x128xf32>, vector<16x128xf32> -> vector<16x128xf32>
    %46 = arith.addf %45, %41 : vector<16x128xf32>
    %cst_32 = arith.constant dense<0.000000e+00> : vector<16x128xf32>
    %47 = tpu.matmul %11, %44, %cst_32 {dimension_numbers = #tpu.dot_dimension_numbers<[1], [0], [0], [1], [0, 0, 1, 1], [], []>} : vector<16x16xf32>, vector<16x128xf32>, vector<16x128xf32> -> vector<16x128xf32>
    %48 = arith.addf %46, %47 : vector<16x128xf32>
    %c0_33 = arith.constant 0 : index
    %c0_34 = arith.constant 0 : index
    %49 = vector.load %arg6[%c0_33, %c0_34] : memref<1x128xf32, #tpu.memory_space<vmem>>, vector<1x128xf32>
    %50 = vector.broadcast %49 : vector<1x128xf32> to vector<16x128xf32>
    %51 = arith.mulf %48, %50 : vector<16x128xf32>
    %c0_35 = arith.constant 0 : index
    %c0_36 = arith.constant 0 : index
    %52 = vector.load %arg7[%c0_35, %c0_36] : memref<1x128xf32, #tpu.memory_space<vmem>>, vector<1x128xf32>
    %53 = vector.broadcast %52 : vector<1x128xf32> to vector<16x128xf32>
    %54 = arith.addf %51, %53 : vector<16x128xf32>
    %cst_37 = arith.constant 0.000000e+00 : f32
    %55 = vector.broadcast %cst_37 : f32 to vector<16x128xf32>
    %56 = arith.maximumf %54, %55 : vector<16x128xf32>
    %c0_38 = arith.constant 0 : index
    %c0_39 = arith.constant 0 : index
    %c0_40 = arith.constant 0 : index
    %57 = vector.load %arg8[%c0_38, %c0_39, %c0_40] : memref<1x16x128xf32, #tpu.memory_space<vmem>>, vector<1x16x128xf32>
    %58 = vector.shape_cast %57 : vector<1x16x128xf32> to vector<16x128xf32>
    %59 = vector.shape_cast %56 : vector<16x128xf32> to vector<1x16x128xf32>
    tpu.vector_store %arg8[%c0_38, %c0_39, %c0_40], %59 {strides = array<i32>} : memref<1x16x128xf32, #tpu.memory_space<vmem>>, vector<1x16x128xf32>,
    return
  }
  func.func @transform_0(%arg0: i32) -> (i32, i32, i32) {
    %c0_i32 = arith.constant 0 : i32
    %c0_i32_0 = arith.constant 0 : i32
    %c0_i32_1 = arith.constant 0 : i32
    return %arg0, %c0_i32, %c0_i32_0 : i32, i32, i32
  }
  func.func @transform_1(%arg0: i32) -> (i32, i32, i32) {
    %c0_i32 = arith.constant 0 : i32
    %c0_i32_0 = arith.constant 0 : i32
    %c0_i32_1 = arith.constant 0 : i32
    %c0_i32_2 = arith.constant 0 : i32
    return %c0_i32, %c0_i32_0, %c0_i32_1 : i32, i32, i32
  }
  func.func @transform_2(%arg0: i32) -> (i32, i32) {
    %c0_i32 = arith.constant 0 : i32
    %c0_i32_0 = arith.constant 0 : i32
    %c0_i32_1 = arith.constant 0 : i32
    return %c0_i32, %c0_i32_0 : i32, i32
  }
  func.func @transform_3(%arg0: i32) -> (i32, i32) {
    %c0_i32 = arith.constant 0 : i32
    %c0_i32_0 = arith.constant 0 : i32
    %c0_i32_1 = arith.constant 0 : i32
    return %c0_i32, %c0_i32_0 : i32, i32
  }
  func.func @transform_4(%arg0: i32) -> (i32, i32, i32) {
    %c0_i32 = arith.constant 0 : i32
    %c0_i32_0 = arith.constant 0 : i32
    %c0_i32_1 = arith.constant 0 : i32
    %c0_i32_2 = arith.constant 0 : i32
    return %c0_i32, %c0_i32_0, %c0_i32_1 : i32, i32, i32
  }
  func.func @transform_5(%arg0: i32) -> (i32, i32) {
    %c0_i32 = arith.constant 0 : i32
    %c0_i32_0 = arith.constant 0 : i32
    %c0_i32_1 = arith.constant 0 : i32
    return %c0_i32, %c0_i32_0 : i32, i32
  }
  func.func @transform_6(%arg0: i32) -> (i32, i32) {
    %c0_i32 = arith.constant 0 : i32
    %c0_i32_0 = arith.constant 0 : i32
    %c0_i32_1 = arith.constant 0 : i32
    return %c0_i32, %c0_i32_0 : i32, i32
  }
  func.func @transform_7(%arg0: i32) -> (i32, i32, i32) {
    %c0_i32 = arith.constant 0 : i32
    %c0_i32_0 = arith.constant 0 : i32
    %c0_i32_1 = arith.constant 0 : i32
    return %arg0, %c0_i32, %c0_i32_0 : i32, i32, i32
  }
}

</mosaic_0001>

<bundles_post_ra>
// kernel: tpu_custom_call.1
= control target key start
LH: loop header
LB: loop body
LE: loop exit
PB: predicated region body
PF: predicated region fallthrough
CT: control target
= control target key end

     0   :  { %12 = vsyncpa [#allocation3], 0  ;;  %s2293_s0 = inlined_call_operand.hbm [shape: bf16[2,16,64], index: 0, kind: input, shape index: {}]   ;;  %s2294_s1 = inlined_call_operand.hbm [shape: bf16[3,64,128], index: 1, kind: input, shape index: {}]   ;;  %s2295_s2 = inlined_call_operand.vmem [shape: f32[1,128], index: 2, kind: input, shape index: {}]   ;;  %s2296_s3 = inlined_call_operand.vmem [shape: f32[1,128], index: 3, kind: input, shape index: {}]   ;;  %s2297_s4 = inlined_call_operand.hbm [shape: bf16[3,128,128], index: 4, kind: input, shape index: {}]   ;;  %s2298_s5 = inlined_call_operand.vmem [shape: f32[1,128], index: 5, kind: input, shape index: {}]   ;;  %s2299_s6 = inlined_call_operand.vmem [shape: f32[1,128], index: 6, kind: input, shape index: {}]   ;;  %s2300_s7 = inlined_call_operand.hbm [shape: f32[2,16,128], index: 7, kind: output, shape index: {}]  }
   0x1   :  { %14 = vsyncpa [#allocation3 + $0x1], 0 }
   0x2   :  { %15 = vsyncpa [#allocation6], 0 }
   0x3   :  { %16 = vsyncpa [#allocation4], 0 }
   0x4   :  { %18 = vsyncpa [#allocation4 + $0x1], 0  ;;  %s1954_s24 = smov 0   ;;  %s1956_s25 = smov 0  }
   0x5   :  { %s1958_s26 = smov 0   ;;  %s1960_s27 = smov 0  }
   0x6 LB: > { %s1975_s28 = sadd.s32 4294967295, %s1902_s27   ;;  %s1362_s29 = sadd.s32 4294967294, %s1902_s27   ;;  %s1902_s27 = sphi %s1960_s27, %s2322_s27   ;;  %s1898_s26 = sphi %s1958_s26, %s2321_s26   ;;  %s1894_s25 = sphi %s1956_s25, %s2320_s25   ;;  %s1890_s24 = sphi %s1954_s24, %s2319_s24  }
   0x7   : > { %p44_p0 = scmp.ne.s32.totalorder %s1894_s25, %s1890_s24  ;;  %p2301_p1 = scmp.eq.s32.totalorder %s1975_s28, 0 }
   0x8   : > { %p200_p3 = scmp.eq.s32.totalorder %s1362_s29, 1  ;;  %p1363_p5 = scmp.ge.s32.totalorder %s1902_s27, 1 }
   0x9   : > { %p1984_p4 = por %p2301_p1, %p44_p0  ;;  %p207_p7 = scmp.lt.s32.totalorder %s1902_s27, 3 }
   0xa   : > { %p1989_p6 = por %p200_p3, %p44_p0  ;;  %s1904_s10 = smov [#allocation5]  }
   0xb   : > { %s2305_s30 = scalar_select %p1984_p4, 1, 0 }
   0xc   : > { %s2306_s8 = scalar_select %p1989_p6, 1, 0 }
   0xd   : > { %p1994_p8 = pnand %p1363_p5, %p207_p7  ;;  %s219_s11 = sshll.u32 %s1904_s10, 4  ;;  %s1998_s11 = int_to_ptr.vmem [resolvable:$true] %s219_s11 }
   0xe   : > { %s1905_s13 = smov [#allocation7]   ;;  %s1746_s17 = scalar_lea.hbm %s2294_s1, 1536 }
   0xf   : > { %p1648_p9 = pneg %p1994_p8  ;;  %s238_s14 = sshll.u32 %s1905_s13, 4  ;;  %s2009_s14 = int_to_ptr.vmem [resolvable:$true] %s238_s14 }
  0x10   : > { %p1747_p12 = scmp.ne.s32.totalorder %s2294_s1, %s1746_s17  ;;  %p1753_p5 = scmp.lt.u32.totalorder %s1746_s17, %s2294_s1 }
  0x11   : > { %p2005_p11 = pnand %p1648_p9, %p2301_p1 }
  0x13   : > { %p1748_p13 = pneg %p2005_p11 }
  0x15   : > { %p1749_p0 = pnand %p1748_p13, %p1747_p12 }
  0x17   : > { %p1750_p3 = pneg %p1749_p0 }
  0x19   : > { %p1755_p7 = pnand %p1753_p5, %p1750_p3 }
  0x1b   : > { %1758 = shalt.err (!%p1755_p7)
}
  0x1c   : > { %s1759_s22 = scalar_lea.vmem %s1998_s11, 1536  ;;  %p1767_p2 = scmp.lt.s32.totalorder %s1998_s11, %s1998_s11 }
  0x1d   : > { %p1760_p9 = scmp.ne.s32.totalorder %s1998_s11, %s1759_s22  ;;  %p1768_p12 = scmp.lt.s32.totalorder %s1759_s22, %s1759_s22 }
  0x1f   : > { %p1762_p10 = pnand %p1760_p9, %p1748_p13  ;;  %p1769_p0 = por %p1768_p12, %p1767_p2 }
  0x21   : > { %p1763_p1 = pneg %p1762_p10 }
  0x23   : > { %p1770_p6 = pnand %p1769_p0, %p1763_p1 }
  0x25   : > { %1773 = shalt.err (!%p1770_p6)
}
  0x26   : > { %s2302_s23 = smov 64   ;;  %s1907_s29 = smov 4  }
  0x27   : > { %1651 = dma.hbm_to_vmem [thread:$0]  (!%p2005_p11), %s2294_s1, 1536, %s1998_s11, [#allocation6], %s2302_s23, %s2302_s23, %s1907_s29  }
  0x28   : > { %s1774_s17 = scalar_lea.hbm %s2297_s4, 3072 }
  0x29   : > { %p1775_p1 = scmp.ne.s32.totalorder %s2297_s4, %s1774_s17  ;;  %p1781_p10 = scmp.lt.u32.totalorder %s1774_s17, %s2297_s4 }
  0x2b   : > { %p1777_p2 = pnand %p1775_p1, %p1748_p13 }
  0x2d   : > { %p1778_p6 = pneg %p1777_p2 }
  0x2f   : > { %p1783_p3 = pnand %p1781_p10, %p1778_p6 }
  0x31   : > { %1786 = shalt.err (!%p1783_p3)
}
  0x32   : > { %s1787_s11 = scalar_lea.vmem %s2009_s14, 3072  ;;  %p1795_p12 = scmp.lt.s32.totalorder %s2009_s14, %s2009_s14 }
  0x33   : > { %p1788_p5 = scmp.ne.s32.totalorder %s2009_s14, %s1787_s11  ;;  %p1796_p0 = scmp.lt.s32.totalorder %s1787_s11, %s1787_s11 }
  0x35   : > { %p1790_p7 = pnand %p1788_p5, %p1748_p13  ;;  %p1797_p1 = por %p1796_p0, %p1795_p12 }
  0x37   : > { %p1791_p9 = pneg %p1790_p7 }
  0x39   : > { %p1798_p2 = pnand %p1797_p1, %p1791_p9 }
  0x3b   : > { %1801 = shalt.err (!%p1798_p2)
}
  0x3c   : > { %1654 = dma.hbm_to_vmem [thread:$0]  (!%p2005_p11), %s2297_s4, 3072, %s2009_s14, [#allocation6], %s2302_s23, %s2302_s23, %s1907_s29  }
  0x3d   : > { %s2070_s12 = sadd.s32 1, %s1902_s27   ;;  %s31_s13 = sadd.s32 1, %s1898_s26 }
  0x3e   : > { %s28_s15 = ssub.s32 %s1902_s27, %s2070_s12  ;;  %p38_p13 = scmp.ne.s32.totalorder %s1898_s26, %s1894_s25 }
  0x3f   : > { %p29_p6 = scmp.eq.s32.totalorder %s28_s15, 0  ;;  %p39_p10 = scmp.eq.s32.totalorder %s1902_s27, 0 }
  0x40   : > { %p2309_p3 = scmp.eq.s32.totalorder %s1975_s28, 1  ;;  %p1665_p7 = scmp.lt.s32.totalorder %s1902_s27, 2 }
  0x41   : > { %s2086_s17 = scalar_select %p29_p6, %s1898_s26, %s31_s13  }
  0x42   : > { %p2080_p5 = por %p2309_p3, %p38_p13  ;;  %p40_p9 = por %p39_p10, %p38_p13 }
  0x43   : > { %s258_s18 = sand.u32 1, %s1898_s26   ;;  %s1436_s14 = sshll.u32 %s1902_s27, 7 }
  0x44   : > { %s2310_s16 = scalar_select %p2080_p5, 1, 0 }
  0x45   : > { %s1367_s19 = sshll.u32 %s258_s18, 3  ;;  %s2093_s11 = scalar_lea.hbm %s2293_s0, %s1436_s14 }
  0x46   : > { %s262_s22 = scalar_lea.vmem [#allocation2], %s1367_s19  ;;  %p2097_p11 = pnand %p1665_p7, %p40_p9 }
  0x47   : > { %s269_s10 = sshll.u32 %s262_s22, 4  ;;  %s2101_s15 = scalar_lea.sflag [#allocation3], %s258_s18  ;;  %s2095_s10 = int_to_ptr.vmem [resolvable:$true] %s269_s10 }
  0x48   : > { %s1802_s23 = scalar_lea.hbm %s2093_s11, 128  ;;  %p1804_p0 = pneg %p2097_p11 }
  0x49   : > { %p1803_p12 = scmp.ne.s32.totalorder %s2093_s11, %s1802_s23  ;;  %s1807_s20 = scalar_lea.hbm %s2293_s0, 256 }
  0x4a   : > { %p1808_p13 = scmp.lt.u32.totalorder %s2093_s11, %s2293_s0  ;;  %p1809_p6 = scmp.lt.u32.totalorder %s1807_s20, %s1802_s23 }
  0x4b   : > { %p1805_p1 = pnand %p1804_p0, %p1803_p12  ;;  %p1811_p3 = scmp.lt.u32.totalorder %s1802_s23, %s2093_s11 }
  0x4c   : > { %p1810_p10 = por %p1809_p6, %p1808_p13 }
  0x4d   : > { %p1806_p2 = pneg %p1805_p1 }
  0x4e   : > { %p1812_p7 = por %p1811_p3, %p1810_p10 }
  0x50   : > { %p1813_p9 = pnand %p1812_p7, %p1806_p2 }
  0x52   : > { %1816 = shalt.err (!%p1813_p9)
}
  0x53   : > { %s1817_s18 = scalar_lea.vmem %s2095_s10, 128  ;;  %s1908_s19 = smov [#allocation2]  }
  0x54   : > { %p1818_p12 = scmp.ne.s32.totalorder %s2095_s10, %s1817_s18  ;;  %s1822_s14 = sshll.u32 %s1908_s19, 4  ;;  %s1823_s14 = int_to_ptr.vmem [resolvable:$false] %s1822_s14 }
  0x55   : > { %s1824_s21 = scalar_lea.vmem %s1823_s14, 256  ;;  %p1825_p4 = scmp.lt.s32.totalorder %s2095_s10, %s1823_s14 }
  0x56   : > { %p1820_p1 = pnand %p1818_p12, %p1804_p0  ;;  %p1826_p13 = scmp.lt.s32.totalorder %s1824_s21, %s1817_s18 }
  0x58   : > { %p1821_p5 = pneg %p1820_p1  ;;  %p1827_p6 = por %p1826_p13, %p1825_p4 }
  0x5a   : > { %p1828_p10 = pnand %p1827_p6, %p1821_p5 }
  0x5c   : > { %1831 = shalt.err (!%p1828_p10)
}
  0x5d   : > { %s2312_s23 = smov 64   ;;  %281 = sbr.rel (%p1994_p8) target bundleno = 1084 (0x43c), region = 48 }
  0x5e   : > { %1658 = dma.hbm_to_vmem [thread:$0]  (!%p2097_p11), %s2093_s11, 128, %s2095_s10, %s2101_s15, %s2312_s23, %s2312_s23, %s1907_s29  }
  0x5f   : > { %s2135_s20 = sand.u32 (!%p1994_p8), 1, %s1894_s25   ;;  %p2313_p4 = scmp.ne.s32.totalorder (!%p1994_p8), %s2305_s30, 0 }
  0x60   : > { %s1371_s22 = sshll.u32 (!%p1994_p8), %s2135_s20, 3  ;;  %s284_s18 = scalar_lea.sflag (!%p1994_p8), [#allocation3], %s2135_s20 }
  0x61   : > { %s287_s19 = scalar_lea.vmem (!%p1994_p8), [#allocation2], %s1371_s22 }
  0x64   : > { %1877 = dma.done.wait (%p2313_p4), %s284_s18, 128  }
  0x65   : > { %1879 = vsyncadd (%p2313_p4), %s284_s18, 4294967168  ;;  %p2314_p5 = scmp.eq.s32.totalorder %s1975_s28, 0 }
  0x67   : > { %1881 = dma.done.wait (%p2314_p5), [#allocation6], 4608   ;;  %p2315_p11 = pmov %p2314_p5 }
  0x68   : > { %v1909_v0 = vmov 0.0   ;;  %vm1910_vm0 = vmmov 0   ;;  %v1709_v1 = vld [vmem:[#allocation5] sm:$0xff]   ;;  %v1710_v2 = vld [vmem:[#allocation5 + $0x8] sm:$0xff]   ;;  %v1711_v3 = vld [vmem:[#allocation5 + $0x10] sm:$0xff]   ;;  %vm386_vm1 = vcmask 523264   ;;  %v327_v14 = vlaneseq }
  0x69   : > { %1883 = vsyncadd (%p2315_p11), [#allocation6], 4294962688  ;;  %1496 = vmatprep.subr.bf16.mxu0 %v1909_v0  ;;  %1504 = vmatprep.mubr.msk.bf16.mxu0 %vm1910_vm0, %v1909_v0  ;;  %v1712_v4 = vld [vmem:[#allocation5 + $0x18] sm:$0xff]   ;;  %v1714_v6 = vld [vmem:[#allocation5 + $0x20] sm:$0xff]   ;;  %vm579_vm3 = vcmask 130048   ;;  %s1374_s10 = sshll.u32 %s2135_s20, 4 }
  0x6a   : > { %1497 = vmatpush3.bf16.msra.mxu0 %v1709_v1  ;;  %v1713_v5 = vld [vmem:[%s287_s19] sm:$0xff]   ;;  %v1715_v7 = vld [vmem:[#allocation5 + $0x28] sm:$0xff]   ;;  %v1718_v10 = vld [vmem:[#allocation5 + $0x40] sm:$0xff]   ;;  %v331_v15 = vand.u32 127, %v327_v14  ;;  %v328_v16 = vshrl.u32 %v327_v14, 7  ;;  %s325_s23 = scalar_lea.vmem [#allocation8], %s1374_s10 }
  0x6b   : > { %1498 = vmatprep.subr.bf16.mxu0 %v1909_v0  ;;  %v1716_v8 = vld [vmem:[#allocation5 + $0x30] sm:$0xff]   ;;  %v1717_v9 = vld [vmem:[#allocation5 + $0x38] sm:$0xff]   ;;  %v1719_v11 = vld [vmem:[#allocation5 + $0x48] sm:$0xff]   ;;  %s1270_s22 = sshll.u32 %s325_s23, 4  ;;  %s1437_s18 = sshll.u32 %s1975_s28, 8  ;;  %s2244_s22 = int_to_ptr.vmem [resolvable:$true] %s1270_s22 }
  0x6c   : > { %v1720_v12 = vld [vmem:[#allocation5 + $0x50] sm:$0xff]   ;;  %v1721_v13 = vld [vmem:[#allocation5 + $0x58] sm:$0xff]   ;;  %v332_v17 = vadd.s32 1, %v331_v15  ;;  %v329_v18 = vadd.s32 8, %v328_v16  ;;  %v339_v21 = vadd.s32 1, %v328_v16  ;;  %v1722_v39 = vld [vmem:[#allocation7] sm:$0xff]   ;;  %s2249_s9 = scalar_lea.hbm %s2300_s7, %s1437_s18 }
  0x6d   : > { %v1723_v40 = vld [vmem:[#allocation7 + $0x40] sm:$0xff]   ;;  %v1724_v41 = vld [vmem:[#allocation7 + $0x8] sm:$0xff]   ;;  %v1726_v43 = vld [vmem:[#allocation7 + $0x10] sm:$0xff]   ;;  %s1257_s29 = scalar_lea.sflag [#allocation4], %s2135_s20  ;;  %s1832_s11 = scalar_lea.vmem %s2244_s22, 256 }
  0x6e   : > { %1499 = vmatpush3.bf16.msra.mxu0 %v1710_v2  ;;  %vm333_vm2 = vcmp.eq.s32.totalorder %v328_v16, %v332_v17  ;;  %vm334_vm4 = vcmp.eq.s32.totalorder %v329_v18, %v332_v17  ;;  %v340_v20 = vadd.s32 1, %v329_v18  ;;  %vm341_vm5 = vcmp.eq.s32.totalorder %v339_v21, %v331_v15  ;;  %v1725_v42 = vld [vmem:[#allocation7 + $0x48] sm:$0xff]   ;;  %v1727_v44 = vld [vmem:[#allocation7 + $0x50] sm:$0xff]   ;;  %v1728_v45 = vld [vmem:[#allocation7 + $0x18] sm:$0xff]   ;;  %p1833_p8 = scmp.ne.s32.totalorder %s2244_s22, %s1832_s11  ;;  %p2316_p0 = scmp.ne.s32.totalorder %s2310_s16, 0 }
  0x6f   : > { %1500 = vmatprep.subr.bf16.mxu0 %v1909_v0  ;;  %v2172_v19 = vsel %vm333_vm2, 1.0, %v1909_v0  ;;  %v2177_v27 = vsel %vm334_vm4, 1.0, %v1909_v0  ;;  %v2180_v28 = vsel %vm341_vm5, 1.0, %v1909_v0  ;;  %v1729_v46 = vld [vmem:[#allocation7 + $0x58] sm:$0xff]   ;;  %v1730_v47 = vld [vmem:[#allocation7 + $0x20] sm:$0xff]   ;;  %v1732_v49 = vld [vmem:[#allocation7 + $0x28] sm:$0xff]  }
  0x70   : > { %1536 = vmatprep.mubr.msk.f32.mxu1 %vm579_vm3, %v2172_v19  ;;  %vm342_vm6 = vcmp.eq.s32.totalorder %v340_v20, %v331_v15  ;;  %v1731_v48 = vld [vmem:[#allocation7 + $0x60] sm:$0xff]   ;;  %v1733_v50 = vld [vmem:[#allocation7 + $0x68] sm:$0xff]   ;;  %v1734_v51 = vld [vmem:[#allocation7 + $0x30] sm:$0xff]   ;;  %p1834_p2 = pnand %p1833_p8, %p2316_p0  ;;  %s1911_s28 = smov [#allocation8]  }
  0x71   : > { %v2190_v38 = vsel %vm342_vm6, 1.0, %v1909_v0  ;;  %v1735_v52 = vld [vmem:[#allocation7 + $0x70] sm:$0xff]   ;;  %v1736_v53 = vld [vmem:[#allocation7 + $0x38] sm:$0xff]   ;;  %v1743_v14 = vld [vmem:[#allocation7 + $0xa8] sm:$0xff]   ;;  %s1836_s10 = sshll.u32 %s1911_s28, 4  ;;  %s1837_s10 = int_to_ptr.vmem [resolvable:$false] %s1836_s10 }
  0x72   : > { %1501 = vmatpush3.bf16.msra.mxu0 %v1711_v3  ;;  %v1737_v54 = vld [vmem:[#allocation7 + $0x78] sm:$0xff]   ;;  %v1399_v60 = vld [vmem:[%s2295_s2] ss:$0 sm:$0xff]  ;;  %p1835_p3 = pneg %p1834_p2  ;;  %s1838_s13 = scalar_lea.vmem %s1837_s10, 512 }
  0x73   : > { %1502 = vmatprep.subr.bf16.mxu0 %v1909_v0  ;;  %v1400_v63 = vld [vmem:[%s2296_s3] ss:$0 sm:$0xff]  ;;  %v1745_v16 = vld [vmem:[#allocation7 + $0xb8] sm:$0xff]   ;;  %p1839_p7 = scmp.lt.s32.totalorder %s2244_s22, %s1837_s10  ;;  %p1840_p9 = scmp.lt.s32.totalorder %s1838_s13, %s1832_s11 }
  0x74   : > { %v1744_v15 = vld [vmem:[#allocation7 + $0xb0] sm:$0xff]  }
  0x75   : > { %p1841_p12 = por %p1840_p9, %p1839_p7 }
  0x76   : > { %1503 = vmatpush3.bf16.msra.mxu0 %v1712_v4 }
  0x77   : > { %1508 = vmatprep.subr.bf16.mxu0 %v1909_v0  ;;  %p1842_p1 = pnand %p1841_p12, %p1835_p3 }
  0x79   : > { %1505 = vmatmul.mubr.msk.bf16.vlgmr.msra.gmra.mrb[0].mxu0 %vm386_vm1, %v1713_v5 }
  0x7a   : > { %1509 = vmatpush3.bf16.msra.mxu0 %v1714_v6  ;;  %1516 = vmatprep.mubr.msk.bf16.mxu0 %vm1910_vm0, %v1909_v0 }
  0x7b   : > { %1510 = vmatprep.subr.bf16.mxu0 %v1909_v0 }
  0x7e   : > { %1511 = vmatpush3.bf16.msra.mxu0 %v1715_v7 }
  0x7f   : > { %1512 = vmatprep.subr.bf16.mxu0 %v1909_v0 }
  0x82   : > { %1513 = vmatpush3.bf16.msra.mxu0 %v1716_v8  ;;  %v1738_v8 = vld [vmem:[#allocation7 + $0x80] sm:$0xff]  }
  0x83   : > { %1514 = vmatprep.subr.bf16.mxu0 %v1909_v0 }
  0x86   : > { %1515 = vmatpush3.bf16.msra.mxu0 %v1717_v9 }
  0x87   : > { %1520 = vmatprep.subr.bf16.mxu0 %v1909_v0 }
  0x89   : > { %1517 = vmatmul.mubr.msk.bf16.vlgmr.msra.gmra.mrb[4].mxu0 %vm386_vm1, %v1713_v5 }
  0x8a   : > { %1521 = vmatpush3.bf16.msra.mxu0 %v1718_v10  ;;  %1528 = vmatprep.mubr.msk.bf16.mxu0 %vm1910_vm0, %v1909_v0  ;;  %v1739_v10 = vld [vmem:[#allocation7 + $0x88] sm:$0xff]  }
  0x8b   : > { %1522 = vmatprep.subr.bf16.mxu0 %v1909_v0 }
  0x8e   : > { %1523 = vmatpush3.bf16.msra.mxu0 %v1719_v11  ;;  %v1740_v11 = vld [vmem:[#allocation7 + $0x90] sm:$0xff]  }
  0x8f   : > { %1524 = vmatprep.subr.bf16.mxu0 %v1909_v0 }
  0x92   : > { %1525 = vmatpush3.bf16.msra.mxu0 %v1720_v12  ;;  %v1741_v12 = vld [vmem:[#allocation7 + $0x98] sm:$0xff]  }
  0x93   : > { %1526 = vmatprep.subr.bf16.mxu0 %v1909_v0 }
  0x96   : > { %1527 = vmatpush3.bf16.msra.mxu0 %v1721_v13  ;;  %v1742_v13 = vld [vmem:[#allocation7 + $0xa0] sm:$0xff]  }
  0x97   : > { %1566 = vmatprep.subr.bf16.mxu0 %v1909_v0 }
  0x99   : > { %1529 = vmatmul.mubr.msk.bf16.vlgmr.msra.gmra.mrb[8].mxu0 %vm386_vm1, %v1713_v5 }
  0x9a   : > { %1582 = vmatprep.mubr.msk.bf16.mxu0 %vm1910_vm0, %v1909_v0  ;;  %1567 = vmatpush3.bf16.msra.mxu0 %v1723_v40 }
  0x9b   : > { %1568 = vmatprep.subr.bf16.mxu0 %v1909_v0 }
  0x9e   : > { %1569 = vmatpush3.bf16.msra.mxu0 %v1725_v42 }
  0x9f   : > { %1570 = vmatprep.subr.bf16.mxu0 %v1909_v0 }
  0xa2   : > { %1571 = vmatpush3.bf16.msra.mxu0 %v1727_v44 }
  0xa3   : > { %1572 = vmatprep.subr.bf16.mxu0 %v1909_v0 }
  0xa6   : > { %1573 = vmatpush3.bf16.msra.mxu0 %v1729_v46 }
  0xa7   : > { %1574 = vmatprep.subr.bf16.mxu0 %v1909_v0 }
  0xaa   : > { %1575 = vmatpush3.bf16.msra.mxu0 %v1731_v48 }
  0xab   : > { %1576 = vmatprep.subr.bf16.mxu0 %v1909_v0 }
  0xae   : > { %1577 = vmatpush3.bf16.msra.mxu0 %v1733_v50 }
  0xaf   : > { %1578 = vmatprep.subr.bf16.mxu0 %v1909_v0 }
  0xb2   : > { %1579 = vmatpush3.bf16.msra.mxu0 %v1735_v52 }
  0xb3   : > { %1580 = vmatprep.subr.bf16.mxu0 %v1909_v0 }
  0xb6   : > { %1581 = vmatpush3.bf16.msra.mxu0 %v1737_v54 }
 0x14c   : > { %v424_v22 = vpop.f32.mrb[0].mxu0 }
 0x14d   : > { %v1506_v23 = vpop.f32.mrb[1].mxu0 }
 0x14e   : > { %v427_v24 = vpop.f32.mrb[2].mxu0 }
 0x14f   : > { %v1620_v25 = vpack.c.bf16 %v427_v24, %v424_v22  ;;  %v1507_v26 = vpop.f32.mrb[3].mxu0 }
 0x151   : > { %1621 = vmatprep.subr.bf16.mxu1 %v1620_v25 }
 0x152   : > { %1623 = vmatpush3.bf16.msra.mxu1 %v1620_v25 }
 0x155   : > { %1537 = vmatmul.mubr.msk.f32.vlgmr.msra.gmra.mrb[0].mxu1 %vm579_vm3, %v2177_v27 }
 0x156   : > { %1543 = vmatprep.mubr.msk.f32.mxu1 %vm579_vm3, %v2180_v28 }
 0x15c   : > { %v2186_v29 = vpop.f32.mrb[4].mxu0 }
 0x15d   : > { %v1518_v30 = vpop.f32.mrb[5].mxu0 }
 0x15e   : > { %v501_v31 = vpop.f32.mrb[6].mxu0 }
 0x15f   : > { %v1519_v32 = vpop.f32.mrb[7].mxu0 }
 0x16c   : > { %v572_v33 = vpop.f32.mrb[8].mxu0 }
 0x16d   : > { %v1530_v34 = vpop.f32.mrb[9].mxu0 }
 0x16e   : > { %v575_v35 = vpop.f32.mrb[10].mxu0 }
 0x16f   : > { %v1624_v36 = vpack.c.bf16 %v575_v35, %v572_v33  ;;  %v1531_v37 = vpop.f32.mrb[11].mxu0 }
 0x171   : > { %1625 = vmatprep.subr.bf16.mxu1 %v1624_v36 }
 0x172   : > { %1627 = vmatpush3.bf16.msra.mxu1 %v1624_v36 }
 0x173   : > { %1546 = vmatprep.subr.bf16.mxu1 %v1909_v0 }
 0x175   : > { %1544 = vmatmul.mubr.msk.f32.vlgmr.msra.gmra.mrb[2].mxu1 %vm579_vm3, %v2190_v38 }
 0x176   : > { %1562 = vmatprep.mubr.msk.bf16.mxu1 %vm1910_vm0, %v1909_v0  ;;  %1547 = vmatpush3.bf16.msra.mxu1 %v1722_v39  ;;  %v1430_v39 = vld [vmem:[%s2299_s6] ss:$0 sm:$0xff] }
 0x177   : > { %1548 = vmatprep.subr.bf16.mxu1 %v1909_v0 }
 0x17a   : > { %1549 = vmatpush3.bf16.msra.mxu1 %v1724_v41 }
 0x17b   : > { %1550 = vmatprep.subr.bf16.mxu1 %v1909_v0 }
 0x17e   : > { %1551 = vmatpush3.bf16.msra.mxu1 %v1726_v43 }
 0x17f   : > { %1552 = vmatprep.subr.bf16.mxu1 %v1909_v0 }
 0x182   : > { %1553 = vmatpush3.bf16.msra.mxu1 %v1728_v45 }
 0x183   : > { %1554 = vmatprep.subr.bf16.mxu1 %v1909_v0 }
 0x186   : > { %1555 = vmatpush3.bf16.msra.mxu1 %v1730_v47 }
 0x187   : > { %1556 = vmatprep.subr.bf16.mxu1 %v1909_v0 }
 0x18a   : > { %1557 = vmatpush3.bf16.msra.mxu1 %v1732_v49 }
 0x18b   : > { %1558 = vmatprep.subr.bf16.mxu1 %v1909_v0 }
 0x18e   : > { %1559 = vmatpush3.bf16.msra.mxu1 %v1734_v51 }
 0x18f   : > { %1560 = vmatprep.subr.bf16.mxu1 %v1909_v0 }
 0x192   : > { %1561 = vmatpush3.bf16.msra.mxu1 %v1736_v53 }
 0x193   : > { %1586 = vmatprep.subr.bf16.mxu1 %v1909_v0 }
 0x228   : > { %v1538_v55 = vpop.f32.mrb[0].mxu1 }
 0x229   : > { %v658_v56 = vadd.f32 %v1538_v55, %v501_v31  ;;  %v652_v57 = vpop.f32.mrb[1].mxu1 }
 0x22a   : > { %v653_v58 = vadd.f32 %v652_v57, %v2186_v29 }
 0x248   : > { %v1545_v59 = vpop.f32.mrb[2].mxu1 }
 0x249   : > { %v743_v61 = vadd.f32 %v1545_v59, %v658_v56  ;;  %v733_v62 = vpop.f32.mrb[3].mxu1 }
 0x24a   : > { %v742_v1 = vadd.f32 %v733_v62, %v653_v58 }
 0x24b   : > { %v752_v2 = vmul.f32 %v1399_v60, %v743_v61 }
 0x24c   : > { %v751_v3 = vmul.f32 %v1399_v60, %v742_v1 }
 0x24d   : > { %v761_v4 = vadd.f32 %v1400_v63, %v752_v2 }
 0x24e   : > { %v760_v5 = vadd.f32 %v1400_v63, %v751_v3 }
 0x24f   : > { %v763_v6 = vmax.f32 %v761_v4, 0.0 }
 0x250   : > { %v762_v7 = vmax.f32 %v760_v5, 0.0 }
 0x252   : > { %v764_v9 = vpack.c.bf16 %v763_v6, %v762_v7 }
 0x254   : > { %1563 = vmatmul.mubr.bf16.vlgmr.msra.gmra.mrb[4].mxu1 %v764_v9  ;;  %1583 = vmatmul.mubr.bf16.vlgmr.msra.gmra.mrb[12].mxu0 %v764_v9 }
 0x255   : > { %1587 = vmatpush3.bf16.msra.mxu1 %v1738_v8  ;;  %1602 = vmatprep.mubr.msk.bf16.mxu1 %vm1910_vm0, %v1909_v0 }
 0x256   : > { %1588 = vmatprep.subr.bf16.mxu1 %v1909_v0 }
 0x259   : > { %1589 = vmatpush3.bf16.msra.mxu1 %v1739_v10 }
 0x25a   : > { %1590 = vmatprep.subr.bf16.mxu1 %v1909_v0 }
 0x25d   : > { %1591 = vmatpush3.bf16.msra.mxu1 %v1740_v11 }
 0x25e   : > { %1592 = vmatprep.subr.bf16.mxu1 %v1909_v0 }
 0x261   : > { %1593 = vmatpush3.bf16.msra.mxu1 %v1741_v12 }
 0x262   : > { %1594 = vmatprep.subr.bf16.mxu1 %v1909_v0 }
 0x265   : > { %1595 = vmatpush3.bf16.msra.mxu1 %v1742_v13 }
 0x266   : > { %1596 = vmatprep.subr.bf16.mxu1 %v1909_v0 }
 0x269   : > { %1597 = vmatpush3.bf16.msra.mxu1 %v1743_v14 }
 0x26a   : > { %1598 = vmatprep.subr.bf16.mxu1 %v1909_v0 }
 0x26d   : > { %1599 = vmatpush3.bf16.msra.mxu1 %v1744_v15 }
 0x26e   : > { %1600 = vmatprep.subr.bf16.mxu1 %v1909_v0 }
 0x271   : > { %1601 = vmatpush3.bf16.msra.mxu1 %v1745_v16 }
 0x274   : > { %1603 = vmatmul.mubr.bf16.vlgmr.msra.gmra.mrb[8].mxu1 %v764_v9 }
 0x275   : > { %1610 = vmatprep.mubr.msk.f32.mxu1 %vm579_vm3, %v2172_v19 }
 0x327   : > { %v863_v17 = vpop.f32.mrb[4].mxu1  ;;  %v969_v18 = vpop.f32.mrb[12].mxu0 }
 0x328   : > { %v1564_v20 = vpop.f32.mrb[5].mxu1  ;;  %v1584_v21 = vpop.f32.mrb[13].mxu0 }
 0x329   : > { %v866_v22 = vpop.f32.mrb[6].mxu1  ;;  %v972_v23 = vpop.f32.mrb[14].mxu0 }
 0x32a   : > { %v1628_v24 = vpack.c.bf16 %v866_v22, %v863_v17  ;;  %v1565_v25 = vpop.f32.mrb[7].mxu1  ;;  %v1585_v26 = vpop.f32.mrb[15].mxu0 }
 0x32c   : > { %1629 = vmatprep.subr.bf16.mxu1 %v1628_v24 }
 0x32d   : > { %1631 = vmatpush3.bf16.msra.mxu1 %v1628_v24 }
 0x330   : > { %1611 = vmatmul.mubr.msk.f32.vlgmr.msra.gmra.mrb[12].mxu1 %vm579_vm3, %v2177_v27 }
 0x331   : > { %1617 = vmatprep.mubr.msk.f32.mxu1 %vm579_vm3, %v2180_v28  ;;  %v1429_v28 = vld [vmem:[%s2298_s5] ss:$0 sm:$0xff] }
 0x347   : > { %v1075_v0 = vpop.f32.mrb[8].mxu1 }
 0x348   : > { %v1604_v19 = vpop.f32.mrb[9].mxu1 }
 0x349   : > { %v1078_v29 = vpop.f32.mrb[10].mxu1 }
 0x34a   : > { %v1632_v30 = vpack.c.bf16 %v1078_v29, %v1075_v0  ;;  %v1605_v31 = vpop.f32.mrb[11].mxu1 }
 0x34c   : > { %1633 = vmatprep.subr.bf16.mxu1 %v1632_v30 }
 0x34d   : > { %1635 = vmatpush3.bf16.msra.mxu1 %v1632_v30 }
 0x350   : > { %1618 = vmatmul.mubr.msk.f32.vlgmr.msra.gmra.mrb[14].mxu1 %vm579_vm3, %v2190_v38 }
 0x403   : > { %v1612_v32 = vpop.f32.mrb[12].mxu1 }
 0x404   : > { %v1154_v33 = vadd.f32 %v1612_v32, %v972_v23  ;;  %v1148_v34 = vpop.f32.mrb[13].mxu1 }
 0x405   : > { %v1149_v35 = vadd.f32 %v1148_v34, %v969_v18 }
 0x423   : > { %v1619_v27 = vpop.f32.mrb[14].mxu1 }
 0x424   : > { %v1233_v36 = vadd.f32 %v1619_v27, %v1154_v33  ;;  %v1223_v37 = vpop.f32.mrb[15].mxu1 }
 0x425   : > { %v1232_v40 = vadd.f32 %v1223_v37, %v1149_v35 }
 0x426   : > { %v1242_v38 = vmul.f32 %v1429_v28, %v1233_v36 }
 0x427   : > { %v1241_v41 = vmul.f32 %v1429_v28, %v1232_v40 }
 0x428   : > { %v1251_v42 = vadd.f32 %v1430_v39, %v1242_v38 }
 0x429   : > { %v1250_v43 = vadd.f32 %v1430_v39, %v1241_v41 }
 0x42a   : > { %v1253_v44 = vmax.f32 %v1251_v42, 0.0 }
 0x42b   : > { %v1252_v45 = vmax.f32 %v1250_v43, 0.0 }
 0x42c   : > { %1255 = vst [vmem:[%s325_s23 + $0x8] sm:$0xff] %v1253_v44 }
 0x42d   : > { %1254 = vst [vmem:[%s325_s23] sm:$0xff] %v1252_v45 }
 0x42e   : > { %1845 = shalt.err (!%p1842_p1)
}
 0x42f   : > { %s1846_s15 = scalar_lea.hbm %s2249_s9, 256  ;;  %s1850_s23 = scalar_lea.hbm %s2300_s7, 512 }
 0x430   : > { %p1847_p13 = scmp.ne.s32.totalorder %s2249_s9, %s1846_s15  ;;  %p1851_p4 = scmp.lt.u32.totalorder %s2249_s9, %s2300_s7 }
 0x431   : > { %p1852_p5 = scmp.lt.u32.totalorder %s1850_s23, %s1846_s15  ;;  %p1854_p8 = scmp.lt.u32.totalorder %s1846_s15, %s2249_s9 }
 0x432   : > { %p1848_p6 = pnand %p1847_p13, %p2316_p0 }
 0x433   : > { %p1853_p11 = por %p1852_p5, %p1851_p4 }
 0x434   : > { %p1849_p10 = pneg %p1848_p6 }
 0x435   : > { %p1855_p2 = por %p1854_p8, %p1853_p11 }
 0x437   : > { %p1856_p3 = pnand %p1855_p2, %p1849_p10 }
 0x439   : > { %1859 = shalt.err (!%p1856_p3)
}
 0x43a   : > { %s1912_s30 = smov 128   ;;  %s1913_s11 = smov 8  }
 0x43b   : > { %1646 = dma.vmem_to_hbm [thread:$0]  (%p2316_p0), %s2244_s22, 256, %s2249_s9, %s1257_s29, %s1912_s30, %s1912_s30, %s1913_s11  }
 0x43c PF: > { %s1285_s28 = sand.u32 1, %s1890_s24   ;;  %p2317_p7 = scmp.ne.s32.totalorder %s2306_s8, 0 }
 0x43d   : > { %p2318_p9 = scmp.ge.s32.totalorder %s1902_s27, 2  ;;  %s1286_s10 = scalar_lea.sflag [#allocation4], %s1285_s28 }
 0x43f   : > { %p1660_p12 = pnand %p2318_p9, %p2317_p7 }
 0x441   : > { %1885 = dma.done.wait (!%p1660_p12), %s1286_s10, 256  }
 0x442   : > { %1887 = vsyncadd (!%p1660_p12), %s1286_s10, 4294967040  ;;  %p21_p1 = scmp.ge.s32.totalorder %s2070_s12, 4   ;;  %s2319_s24 = smov %s1894_s25 }
 0x443   : > { %s2320_s25 = smov %s1898_s26  ;;  %s2321_s26 = smov %s2086_s17 }
 0x444   : > { %s2322_s27 = smov %s2070_s12  ;;  %23 = sbr.rel (!%p21_p1) target bundleno = 6 (0x6), region = 105 }
 0x44b   :  { %1291 = vsyncpa [#allocation3], 1 }
 0x44c   :  { %1293 = vsyncpa [#allocation3 + $0x1], 1 }
 0x44d   :  { %1294 = vsyncpa [#allocation6], 1 }
 0x44e   :  { %1295 = vsyncpa [#allocation4], 1 }
 0x44f   :  { %1297 = vsyncpa [#allocation4 + $0x1], 1 }

</bundles_post_ra>
